<compile_context>
chip_gen: v5e
topology: v5e:2x2
jax: 0.10.0
libtpu: 0.0.40
codegen_flags: <defaults>
</compile_context>

<pallas_src>
import jax
import jax.numpy as jnp
from jax.experimental import pallas as pl
from jax.experimental.pallas import tpu as pltpu

HIDDEN = 16  # explainer hidden width: Linear(2D, 16) -> ReLU -> Linear(16, 1)

_VMEM_BUDGET_BYTES = 48 * 1024 * 1024   # conservative working budget (v7x: 64 MiB/TC)
_VMEM_LIMIT_BYTES = 56 * 1024 * 1024    # scoped-VMEM limit handed to the compiler


# -----------------------------------------------------------------------------
# Pallas kernels
# -----------------------------------------------------------------------------
def xw_kernel(x_ref, wm_ref, xw_ref):
    # XW = X @ Wm  (computed once, reused by both model calls).
    xw = jnp.dot(x_ref[...], wm_ref[...], preferred_element_type=jnp.float32)
    xw_ref[...] = xw.astype(xw_ref.dtype)


def gnn_p_kernel(a_ref, xw_ref, w1_ref, p_ref):
    # node_emb_blk = relu(A_blk @ XW)                     (bf16 x bf16 -> f32 acc)
    # P_blk        = node_emb_blk @ [W1_row | W1_col]     -> [tm, 2*HIDDEN]
    # node_emb stays in VMEM / registers; only P (bf16) goes back to HBM.
    h = jnp.dot(a_ref[...], xw_ref[...], preferred_element_type=jnp.float32)
    h = jnp.maximum(h, 0.0).astype(jnp.bfloat16)
    p = jnp.dot(h, w1_ref[...], preferred_element_type=jnp.float32)
    p_ref[...] = p.astype(p_ref.dtype)


def gnn_pool_kernel(a_ref, xw_ref, pool_ref, g_ref):
    # graph_emb_partial += pool_blk @ relu(A_blk @ XW), accumulated across row blocks
    # of this split (grid axis 1, "arbitrary"); splits (grid axis 0) are independent.
    @pl.when(pl.program_id(1) == 0)
    def _():
        g_ref[...] = jnp.zeros_like(g_ref)

    h = jnp.dot(a_ref[...], xw_ref[...], preferred_element_type=jnp.float32)
    h = jnp.maximum(h, 0.0).astype(jnp.bfloat16)
    g_ref[...] += jnp.dot(pool_ref[...], h, preferred_element_type=jnp.float32)


def explainer_kernel(g_ref, w2_ref, gate_ref, mask_ref):
    # g:    [HIDDEN, TE]  W1-projected, gathered, +b1 (edges on the lane axis, bf16)
    # w2:   [HIDDEN, 1]
    # gate: [1, TE]       log(eps) - log(1-eps) + b2 (precomputed lane-dense row)
    # mask: [1, TE]       lane-dense output block
    h = jnp.maximum(g_ref[...].astype(jnp.float32), 0.0)               # ReLU
    # Second Linear as a VPU multiply + sublane reduce (no N=1 MXU matmul).
    sw = jnp.sum(h * w2_ref[...], axis=0, keepdims=True)               # [1, TE]
    mask_ref[...] = jax.nn.sigmoid(gate_ref[...] + sw)                 # temperature = 1


# -----------------------------------------------------------------------------
# Tiling plan
# -----------------------------------------------------------------------------
def _plan_row_tiling(n_nodes, d_latent):
    """Pick row tile tm and padded node count n_pad (multiple of tm) for the A sweeps.

    Budget: double-buffered bf16 A row block (tm x ~N) + resident XW / W1
    (charged at 2x for the default double-buffering of invariant specs) + small
    per-row outputs must fit _VMEM_BUDGET_BYTES."""
    n8 = -(-n_nodes // 8) * 8
    resident = 2 * (n8 * d_latent * 2) + 2 * (d_latent * 2 * HIDDEN * 2)

    def fits(tm):
        a_tile = 2 * (tm * n8 * 2)                          # double-buffered bf16 A block
        io = 2 * tm * max(2 * HIDDEN * 2, d_latent * 4)     # P / pool / XW row blocks
        return resident + a_tile + io <= _VMEM_BUDGET_BYTES

    if n8 <= 1024 and fits(n8):
        tm = n8                                             # whole sweep, single block
    else:
        tm = 128                                            # tiled: tm multiple of 128
        for cand in (1024, 512, 256):
            if fits(cand):
                tm = cand
                break
    n_pad = -(-n_nodes // tm) * tm
    return tm, n_pad


def _edge_padding(num_edges):
    """Pad the edge axis to a lane-dense multiple of the explainer tile TE."""
    te = 4096
    if num_edges <= te:
        e_pad = -(-num_edges // 128) * 128
        return e_pad, e_pad
    e_pad = -(-num_edges // te) * te
    return e_pad, te


# -----------------------------------------------------------------------------
# pallas_call wrappers
# -----------------------------------------------------------------------------
def compute_xw(x_pad_bf16, wm_bf16, tm):
    n_pad, f = x_pad_bf16.shape
    d = wm_bf16.shape[1]
    return pl.pallas_call(
        xw_kernel,
        out_shape=jax.ShapeDtypeStruct((n_pad, d), jnp.bfloat16),
        grid=(n_pad // tm,),
        in_specs=[pl.BlockSpec((tm, f), lambda i: (i, 0)),
                  pl.BlockSpec((f, d), lambda i: (0, 0))],
        out_specs=pl.BlockSpec((tm, d), lambda i: (i, 0)),
        compiler_params=pltpu.CompilerParams(
            dimension_semantics=("parallel",),
            vmem_limit_bytes=_VMEM_LIMIT_BYTES),
    )(x_pad_bf16, wm_bf16)


def gnn_project(a_bf16, xw_bf16, w1_all_bf16, tm):
    n_pad = a_bf16.shape[0]
    d = xw_bf16.shape[1]
    p2 = w1_all_bf16.shape[1]                    # 2 * HIDDEN
    return pl.pallas_call(
        gnn_p_kernel,
        out_shape=jax.ShapeDtypeStruct((n_pad, p2), jnp.bfloat16),
        grid=(n_pad // tm,),
        in_specs=[pl.BlockSpec((tm, n_pad), lambda i: (i, 0)),   # A row block
                  pl.BlockSpec((n_pad, d), lambda i: (0, 0)),    # XW resident
                  pl.BlockSpec((d, p2), lambda i: (0, 0))],      # W1 (split-concat)
        out_specs=pl.BlockSpec((tm, p2), lambda i: (i, 0)),
        compiler_params=pltpu.CompilerParams(
            dimension_semantics=("parallel",),
            vmem_limit_bytes=_VMEM_LIMIT_BYTES),
    )(a_bf16, xw_bf16, w1_all_bf16)


def gnn_pooled(a_bf16, xw_bf16, pool_bf16, tm):
    n_pad = a_bf16.shape[0]
    d = xw_bf16.shape[1]
    b = pool_bf16.shape[0]
    nblocks = n_pad // tm
    nsplit = 2 if (nblocks >= 2 and nblocks % 2 == 0) else 1
    npb = nblocks // nsplit
    partials = pl.pallas_call(
        gnn_pool_kernel,
        out_shape=jax.ShapeDtypeStruct((nsplit, b, d), jnp.float32),
        grid=(nsplit, npb),
        in_specs=[pl.BlockSpec((tm, n_pad), lambda s, j: (s * npb + j, 0)),
                  pl.BlockSpec((n_pad, d), lambda s, j: (0, 0)),
                  pl.BlockSpec((b, tm), lambda s, j: (0, s * npb + j))],
        out_specs=pl.BlockSpec((None, b, d), lambda s, j: (s, 0, 0)),
        compiler_params=pltpu.CompilerParams(
            dimension_semantics=("parallel", "arbitrary"),
            vmem_limit_bytes=_VMEM_LIMIT_BYTES),
    )(a_bf16, xw_bf16, pool_bf16)
    return partials.sum(axis=0)                  # tiny [nsplit, B, D] -> [B, D]


def explainer_sample(g_t_bf16, w2, gate, te):
    hdim, e_pad = g_t_bf16.shape
    return pl.pallas_call(
        explainer_kernel,
        out_shape=jax.ShapeDtypeStruct((1, e_pad), jnp.float32),
        grid=(e_pad // te,),
        in_specs=[pl.BlockSpec((hdim, te), lambda i: (0, i)),
                  pl.BlockSpec((hdim, 1), lambda i: (0, 0)),
                  pl.BlockSpec((1, te), lambda i: (0, i))],
        out_specs=pl.BlockSpec((1, te), lambda i: (0, i)),
        compiler_params=pltpu.CompilerParams(
            dimension_semantics=("parallel",),
            vmem_limit_bytes=_VMEM_LIMIT_BYTES),
    )(g_t_bf16, w2, gate)


# -----------------------------------------------------------------------------
# Glue (plain JAX) + forward
# -----------------------------------------------------------------------------
def build_adjacency_bf16(edge_index, edge_weight, num_nodes, n_pad):
    # Built directly in bf16: the GNN sweeps are memory-bound on A, so no f32
    # scratch build + cast.  Rows/cols padded to n_pad (zero padding is inert).
    rows, cols = edge_index[0], edge_index[1]
    diag = jnp.arange(num_nodes)
    a = jnp.zeros((n_pad, n_pad), jnp.bfloat16)
    a = a.at[rows, cols].add(edge_weight.astype(jnp.bfloat16))
    a = a.at[diag, diag].add(jnp.ones((num_nodes,), jnp.bfloat16))   # self loops
    return a


def build_pool(batch, num_graphs, n_pad):
    n = batch.shape[0]
    onehot = (batch[None, :] == jnp.arange(num_graphs)[:, None]).astype(jnp.float32)
    counts = jnp.maximum(onehot.sum(axis=1, keepdims=True), 1.0)
    pool = onehot / counts                                           # mean pooling
    pool = jnp.pad(pool, ((0, 0), (0, n_pad - n)))
    return pool.astype(jnp.bfloat16)


def spatial_attention_net_forward(params, node_feature, edge_index, batch,
                                  num_graphs, rng):
    N, _ = node_feature.shape
    D = params["wm"].shape[1]
    rows, cols = edge_index[0], edge_index[1]
    E = rows.shape[0]

    tm, n_pad = _plan_row_tiling(N, D)

    # Hoisted: XW = X @ Wm is identical in both model calls (only A changes).
    x_pad = jnp.pad(node_feature, ((0, n_pad - N), (0, 0))).astype(jnp.bfloat16)
    xw = compute_xw(x_pad, params["wm"].astype(jnp.bfloat16), tm)    # [n_pad, D] bf16

    # --- model call 1 (unit edge weights), fused with the explainer W1 projection.
    a1 = build_adjacency_bf16(edge_index, jnp.ones((E,), jnp.float32), N, n_pad)
    p = gnn_project(a1, xw, params["w1_all"], tm)                    # [n_pad, 2H] bf16
    p = p[:N].astype(jnp.float32)

    # --- per-edge gather-add replaces the [E, 2D] concat materialization.
    g = p[rows, :HIDDEN] + p[cols, HIDDEN:] + params["b1"]           # [E, H] f32
    e_pad, te = _edge_padding(E)
    g_t = jnp.pad(g, ((0, e_pad - E), (0, 0))).T.astype(jnp.bfloat16)  # [H, E_pad]

    # --- concrete-relaxation noise (plain JAX: the pltpu hardware PRNG is TPU-only
    #     and has no interpret/CPU lowering), folded with b2 into one gate row.
    u = jax.random.uniform(rng, (1, e_pad), jnp.float32)
    bias = 0.0 + 0.0001
    eps = (bias - (1.0 - bias)) * u + (1.0 - bias)
    gate = jnp.log(eps) - jnp.log(1.0 - eps) + params["b2"][0]       # temperature = 1

    # --- explainer tail (lane-dense, tiled over edges).
    mask_row = explainer_sample(g_t, params["w2"], gate, te)         # [1, E_pad]
    edge_mask = mask_row[0, :E]                                      # [E]

    # --- model call 2 with edge_weight = edge_mask, mean-pooled per graph.
    a2 = build_adjacency_bf16(edge_index, edge_mask, N, n_pad)
    pool = build_pool(batch, num_graphs, n_pad)                      # [B, n_pad] bf16
    graph_emb = gnn_pooled(a2, xw, pool, tm)                         # [B, D] f32
    return graph_emb


# -----------------------------------------------------------------------------
# Parameters (shapes implied by the module __init__)
# -----------------------------------------------------------------------------
def init_params(key, feat_dim, latent_dim):
    expl_in = latent_dim * 2
    k = jax.random.split(key, 5)
    scale = lambda fan_in: 1.0 / jnp.sqrt(jnp.float32(fan_in))
    w1 = jax.random.normal(k[1], (expl_in, HIDDEN), jnp.float32) * scale(expl_in)
    # Hoisted split-concat of the explainer first Linear: [W1_row | W1_col] maps
    # node_emb [*, D] -> P [*, 2H] so row/col halves are gathered after projection.
    w1_all = jnp.concatenate([w1[:latent_dim], w1[latent_dim:]], axis=1)
    return {
        # stand-in GNN ("self.model") weight
        "wm": jax.random.normal(k[0], (feat_dim, latent_dim), jnp.float32) * scale(feat_dim),
        # explainer_model: Linear(2D, 16) -> ReLU -> Linear(16, 1)
        "w1_all": w1_all.astype(jnp.bfloat16),                       # [D, 2H]
        "b1": jax.random.normal(k[2], (1, HIDDEN), jnp.float32) * 0.01,
        "w2": jax.random.normal(k[3], (HIDDEN, 1), jnp.float32) * scale(HIDDEN),
        "b2": jax.random.normal(k[4], (1,), jnp.float32) * 0.01,
    }
    # NOTE: self.mlp (Linear(D,16)->Linear(16,2)) is never used in forward().


# -----------------------------------------------------------------------------
if __name__ == "__main__":
    key = jax.random.PRNGKey(0)
    k_feat, k_edge, k_params, k_noise = jax.random.split(key, 4)

    # Small deterministic problem: 2 graphs, 16 nodes, 8 features, latent 8, 32 edges.
    N, F, D, E, B = 16, 8, 8, 32, 2

    node_feature = jax.random.normal(k_feat, (N, F), jnp.float32)
    edge_index = jax.random.randint(k_edge, (2, E), 0, N, dtype=jnp.int32)
    batch = jnp.concatenate([jnp.zeros((N // 2,), jnp.int32),
                             jnp.ones((N - N // 2,), jnp.int32)])

    params = init_params(k_params, F, D)

    graph_emb = spatial_attention_net_forward(
        params, node_feature, edge_index, batch, num_graphs=B, rng=k_noise)
    graph_emb = jax.block_until_ready(graph_emb)

    assert graph_emb.shape == (B, D), graph_emb.shape
    assert bool(jnp.all(jnp.isfinite(graph_emb)))
    print("KERNEL_OK")
</pallas_src>

<mosaic_0001>
module attributes {stable_mosaic.version = 11 : i64} {
  func.func @xw_kernel(%arg0: i32, %arg1: memref<16x8xbf16, #tpu.memory_space<vmem>>, %arg2: memref<8x8xbf16, #tpu.memory_space<vmem>>, %arg3: memref<16x8xbf16, #tpu.memory_space<vmem>>) attributes {dimension_semantics = [#tpu.dimension_semantics<parallel>], iteration_bounds = array<i64: 1>, scalar_prefetch = 0 : i64, scratch_operands = 0 : i64, tpu.core_type = #tpu.core_type<tc>, window_params = [{transform_indices = @transform_0, window_bounds = array<i64: 16, 8>}, {pipeline_mode = #tpu.pipeline_mode<synchronous>, transform_indices = @transform_1, window_bounds = array<i64: 8, 8>}, {transform_indices = @transform_2, window_bounds = array<i64: 16, 8>}]} {
    %c0 = arith.constant 0 : index
    %c0_0 = arith.constant 0 : index
    %0 = vector.load %arg1[%c0, %c0_0] : memref<16x8xbf16, #tpu.memory_space<vmem>>, vector<16x8xbf16>
    %c0_1 = arith.constant 0 : index
    %c0_2 = arith.constant 0 : index
    %1 = vector.load %arg2[%c0_1, %c0_2] : memref<8x8xbf16, #tpu.memory_space<vmem>>, vector<8x8xbf16>
    %cst = arith.constant dense<0.000000e+00> : vector<16x8xf32>
    %2 = tpu.matmul %0, %1, %cst {dimension_numbers = #tpu.dot_dimension_numbers<[1], [0], [0], [1], [0, 0, 1, 1], [], []>} : vector<16x8xbf16>, vector<8x8xbf16>, vector<16x8xf32> -> vector<16x8xf32>
    %3 = arith.truncf %2 : vector<16x8xf32> to vector<16x8xbf16>
    %c0_3 = arith.constant 0 : index
    %c0_4 = arith.constant 0 : index
    %4 = vector.load %arg3[%c0_3, %c0_4] : memref<16x8xbf16, #tpu.memory_space<vmem>>, vector<16x8xbf16>
    tpu.vector_store %arg3[%c0_3, %c0_4], %3 {strides = array<i32>} : memref<16x8xbf16, #tpu.memory_space<vmem>>, vector<16x8xbf16>,
    return
  }
  func.func @transform_0(%arg0: i32) -> (i32, i32) {
    %c0_i32 = arith.constant 0 : i32
    %c0_i32_0 = arith.constant 0 : i32
    return %arg0, %c0_i32 : i32, i32
  }
  func.func @transform_1(%arg0: i32) -> (i32, i32) {
    %c0_i32 = arith.constant 0 : i32
    %c0_i32_0 = arith.constant 0 : i32
    %c0_i32_1 = arith.constant 0 : i32
    return %c0_i32, %c0_i32_0 : i32, i32
  }
  func.func @transform_2(%arg0: i32) -> (i32, i32) {
    %c0_i32 = arith.constant 0 : i32
    %c0_i32_0 = arith.constant 0 : i32
    return %arg0, %c0_i32 : i32, i32
  }
}

</mosaic_0001>

<bundles_post_ra>
// kernel: tpu_custom_call.1
= control target key start
LH: loop header
LB: loop body
LE: loop exit
PB: predicated region body
PF: predicated region fallthrough
CT: control target
= control target key end

     0   :  { %vm24_vm0 = vcmask 1043456   ;;  %vm20_vm1 = vcmask 64512   ;;  %vm44_vm2 = vcmask 60416   ;;  %s84_s1 = inlined_call_operand.vmem [shape: bf16[8,8], index: 1, kind: input, shape index: {}]   ;;  %s85_s0 = inlined_call_operand.vmem [shape: bf16[16,8], index: 0, kind: input, shape index: {}]   ;;  %s86_s2 = inlined_call_operand.vmem [shape: bf16[16,8], index: 2, kind: output, shape index: {}]  }
   0x1   :  { %v14_v0 = vld [vmem:[%s84_s1] sm:$0xf] }
   0x2   :  { %v26_v1 = vsel %vm24_vm0, %v14_v0, 0  ;;  %v56_v2 = vld [vmem:[%s85_s0] sm:$0xff] }
   0x3   :  { %35 = vmatpush.bf16.msra.mxu0 %v26_v1 }
   0x6   :  { %55 = vmatmul.msk.bf16.vlgmr.msra.gmra.mxu0 %vm20_vm1, %v56_v2 }
  0x83   :  { %v37_v3 = vpop.f32.mrf.mxu0 }
  0x84   :  { %v42_v4 = vpack.c.bf16 %v37_v3, %v37_v3 }
  0x86   :  { %45 = vst.msk [vmem:[%s86_s2] sm:$0xf] %vm44_vm2, %v42_v4 }
  0x8b   :  { %v39_v5 = vpop.f32.mrf.mxu0 }
  0x8c   :  { %v43_v6 = vpack.c.bf16 %v39_v5, %v39_v5 }
  0x8e   :  { %46 = vst.msk [vmem:[%s86_s2 + $0x4] sm:$0xf] %vm44_vm2, %v43_v6 }

</bundles_post_ra>
